<compile_context>
chip_gen: v5e
topology: v5e:2x2
jax: 0.10.0
libtpu: 0.0.40
codegen_flags: <defaults>
</compile_context>

<pallas_src>
import numpy as np
import jax
import jax.numpy as jnp
from jax import lax
from jax.experimental import pallas as pl
from jax.experimental.pallas import tpu as pltpu


# ----------------------------------------------------------------------------
# Pallas kernel: one folded matmul + BN scale/shift + ReLU per grid step
# ----------------------------------------------------------------------------
def _convbn_relu_kernel(x_ref, w_ref, scale_ref, shift_ref, o_ref):
    # x_ref:     (1, 9*Cin, TM)  im2col patch block (channel-major), bf16
    # w_ref:     (Cout, 9*Cin)   folded conv weights, bf16 (resident across grid)
    # scale_ref: (Cout, 1)       folded BN scale, f32
    # shift_ref: (Cout, 1)       folded BN shift (conv bias folded in), f32
    # o_ref:     (1, Cout, TM)   output block (already NCHW layout), lane-dense
    acc = jnp.dot(w_ref[...], x_ref[0],
                  preferred_element_type=jnp.float32)             # (Cout, TM) on MXU
    y = jnp.maximum(acc * scale_ref[...] + shift_ref[...], 0.0)   # BN + ReLU, f32
    o_ref[0] = y.astype(o_ref.dtype)                              # one lane-dense store


def _pick_spatial_tile(HW, K9, Cout, min_tiles=1):
    """Largest tile TM of the flattened H*W axis such that:
       - TM divides HW and is 128-lane aligned (or is the full axis),
       - double-buffered per-step blocks stay under a small VMEM budget,
       - at least `min_tiles` tiles exist (feeds both v7x TCs when B == 1)."""
    budget = 8 << 20

    def blk_bytes(tm):
        return 2 * (K9 * tm * 2) + 2 * (Cout * tm * 4)   # in + out, double-buffered

    divisors = [HW // n for n in range(1, HW + 1) if HW % n == 0]
    ok = [tm for tm in divisors
          if (tm == HW or tm % 128 == 0)
          and HW // tm >= min_tiles
          and blk_bytes(tm) <= budget]
    if ok:
        return max(ok)
    aligned = [tm for tm in divisors if tm == HW or tm % 128 == 0]
    return max(aligned) if aligned else HW


def conv_bn_relu(x_nchw, w_hwio, scale, shift, out_dtype=jnp.float32):
    """Fused ConvBatchNorm (3x3 conv, pad=1, eval-mode BN) + ReLU. NCHW in / NCHW out.
    Numerics contract: inputs/weights are fed to the MXU in bf16 with f32 accumulation."""
    B, Cin, H, W = x_nchw.shape
    Cout = w_hwio.shape[-1]
    assert w_hwio.shape[:3] == (3, 3, Cin)
    K9, HW = 9 * Cin, H * W

    # --- im2col-lite (tap fold), built directly from NCHW: no transposes needed ---
    xp = jnp.pad(x_nchw, ((0, 0), (0, 0), (1, 1), (1, 1)))          # pad=1 halo
    taps = [xp[:, :, ki:ki + H, kj:kj + W]                          # 9 shifted views
            for ki in range(3) for kj in range(3)]
    x9 = jnp.stack(taps, axis=1).reshape(B, K9, HW).astype(jnp.bfloat16)

    # weights -> (Cout, 9*Cin), matching the (tap, cin) channel order of x9
    w9t = jnp.transpose(w_hwio.reshape(K9, Cout), (1, 0)).astype(jnp.bfloat16)
    scale2 = scale.reshape(Cout, 1).astype(jnp.float32)
    shift2 = shift.reshape(Cout, 1).astype(jnp.float32)

    min_tiles = 2 if B == 1 else 1                   # keep both v7x TensorCores fed
    TM = _pick_spatial_tile(HW, K9, Cout, min_tiles)
    n_tiles = HW // TM

    # VMEM budget estimate (double-buffered blocks), clamped v7x-safe (64 MiB phys).
    est = 2 * (K9 * TM * 2) + 2 * (Cout * TM * 4) + Cout * K9 * 2 + 2 * Cout * 4
    vmem_limit = int(min(48 << 20, max(16 << 20, 4 * est)))

    out = pl.pallas_call(
        _convbn_relu_kernel,
        out_shape=jax.ShapeDtypeStruct((B, Cout, HW), out_dtype),
        grid_spec=pltpu.PrefetchScalarGridSpec(
            num_scalar_prefetch=0,
            grid=(B, n_tiles),
            in_specs=[
                pl.BlockSpec((1, K9, TM), lambda b, t: (b, 0, t)),
                pl.BlockSpec((Cout, K9), lambda b, t: (0, 0)),
                pl.BlockSpec((Cout, 1), lambda b, t: (0, 0)),
                pl.BlockSpec((Cout, 1), lambda b, t: (0, 0)),
            ],
            out_specs=pl.BlockSpec((1, Cout, TM), lambda b, t: (b, 0, t)),
        ),
        compiler_params=pltpu.CompilerParams(
            dimension_semantics=("parallel", "parallel"),
            vmem_limit_bytes=vmem_limit,
        ),
    )(x9, w9t, scale2, shift2)

    return out.reshape(B, Cout, H, W)        # contiguous reshape: already NCHW layout


# ----------------------------------------------------------------------------
# Parameter construction (matches nn.Conv2d(3x3, pad=1) + nn.BatchNorm2d, eval)
# ----------------------------------------------------------------------------
# TODO(synk): training-mode BatchNorm (batch statistics + running-stat update)
# is not implemented; only the eval-mode fold to scale/shift is reproduced.
def make_convbn_params(key, cin, cout):
    k1, k2, k3, k4, k5, k6 = jax.random.split(key, 6)
    w = jax.random.normal(k1, (3, 3, cin, cout), jnp.float32) * np.sqrt(2.0 / (9 * cin))
    b = 0.01 * jax.random.normal(k2, (cout,), jnp.float32)
    gamma = 1.0 + 0.1 * jax.random.normal(k3, (cout,), jnp.float32)
    beta = 0.1 * jax.random.normal(k4, (cout,), jnp.float32)
    running_mean = 0.05 * jax.random.normal(k5, (cout,), jnp.float32)
    running_var = 1.0 + 0.1 * jax.random.uniform(k6, (cout,), jnp.float32)
    eps = 1e-5
    scale = gamma / jnp.sqrt(running_var + eps)          # eval-mode BN folded
    shift = (b - running_mean) * scale + beta            # conv bias folded in
    return w, scale, shift


# ----------------------------------------------------------------------------
# Plain-JAX reference (same bf16-input / f32-accumulate numerics as the kernel)
# ----------------------------------------------------------------------------
def conv_bn_relu_ref(x_nchw, w_hwio, scale, shift):
    y = lax.conv_general_dilated(
        x_nchw.astype(jnp.bfloat16), w_hwio.astype(jnp.bfloat16),
        window_strides=(1, 1), padding="SAME",
        dimension_numbers=("NCHW", "HWIO", "NCHW"),
        preferred_element_type=jnp.float32)
    y = y * scale.reshape(1, -1, 1, 1) + shift.reshape(1, -1, 1, 1)
    return jnp.maximum(y, 0.0)


if __name__ == "__main__":
    # Small shapes consistent with the module (CDNet's ConvBatchNorm stacks
    # use small channel counts like 3->8, 8->16 on small feature maps).
    B, H, W = 2, 16, 16
    key = jax.random.PRNGKey(0)

    fused = jax.jit(conv_bn_relu)
    for (cin, cout) in [(3, 8), (8, 16)]:
        key, kx, kp = jax.random.split(key, 3)
        x = jax.random.normal(kx, (B, cin, H, W), jnp.float32)
        w, scale, shift = make_convbn_params(kp, cin, cout)

        out = jax.block_until_ready(fused(x, w, scale, shift))

        ref = conv_bn_relu_ref(x, w, scale, shift)
        assert out.shape == (B, cout, H, W)
        np.testing.assert_allclose(np.asarray(out), np.asarray(ref),
                                   rtol=2e-3, atol=2e-3)

    print("KERNEL_OK")
</pallas_src>

<mosaic_0001>
module attributes {stable_mosaic.version = 11 : i64} {
  func.func @_convbn_relu_kernel(%arg0: i32, %arg1: i32, %arg2: memref<1x27x256xbf16, #tpu.memory_space<vmem>>, %arg3: memref<8x27xbf16, #tpu.memory_space<vmem>>, %arg4: memref<8x1xf32, #tpu.memory_space<vmem>>, %arg5: memref<8x1xf32, #tpu.memory_space<vmem>>, %arg6: memref<1x8x256xf32, #tpu.memory_space<vmem>>) attributes {dimension_semantics = [#tpu.dimension_semantics<parallel>, #tpu.dimension_semantics<parallel>], iteration_bounds = array<i64: 2, 1>, scalar_prefetch = 0 : i64, scratch_operands = 0 : i64, tpu.core_type = #tpu.core_type<tc>, window_params = [{transform_indices = @transform_0, window_bounds = array<i64: 1, 27, 256>}, {pipeline_mode = #tpu.pipeline_mode<synchronous>, transform_indices = @transform_1, window_bounds = array<i64: 8, 27>}, {pipeline_mode = #tpu.pipeline_mode<synchronous>, transform_indices = @transform_2, window_bounds = array<i64: 8, 1>}, {pipeline_mode = #tpu.pipeline_mode<synchronous>, transform_indices = @transform_3, window_bounds = array<i64: 8, 1>}, {transform_indices = @transform_4, window_bounds = array<i64: 1, 8, 256>}]} {
    %c0 = arith.constant 0 : index
    %c0_0 = arith.constant 0 : index
    %0 = vector.load %arg3[%c0, %c0_0] : memref<8x27xbf16, #tpu.memory_space<vmem>>, vector<8x27xbf16>
    %c0_1 = arith.constant 0 : index
    %c0_2 = arith.constant 0 : index
    %c0_3 = arith.constant 0 : index
    %1 = vector.load %arg2[%c0_1, %c0_2, %c0_3] : memref<1x27x256xbf16, #tpu.memory_space<vmem>>, vector<1x27x256xbf16>
    %2 = vector.shape_cast %1 : vector<1x27x256xbf16> to vector<27x256xbf16>
    %cst = arith.constant dense<0.000000e+00> : vector<8x256xf32>
    %3 = tpu.matmul %0, %2, %cst {dimension_numbers = #tpu.dot_dimension_numbers<[1], [0], [0], [1], [0, 0, 1, 1], [], []>} : vector<8x27xbf16>, vector<27x256xbf16>, vector<8x256xf32> -> vector<8x256xf32>
    %c0_4 = arith.constant 0 : index
    %c0_5 = arith.constant 0 : index
    %4 = vector.load %arg4[%c0_4, %c0_5] : memref<8x1xf32, #tpu.memory_space<vmem>>, vector<8x1xf32>
    %5 = vector.broadcast %4 : vector<8x1xf32> to vector<8x256xf32>
    %6 = arith.mulf %3, %5 : vector<8x256xf32>
    %c0_6 = arith.constant 0 : index
    %c0_7 = arith.constant 0 : index
    %7 = vector.load %arg5[%c0_6, %c0_7] : memref<8x1xf32, #tpu.memory_space<vmem>>, vector<8x1xf32>
    %8 = vector.broadcast %7 : vector<8x1xf32> to vector<8x256xf32>
    %9 = arith.addf %6, %8 : vector<8x256xf32>
    %cst_8 = arith.constant 0.000000e+00 : f32
    %10 = vector.broadcast %cst_8 : f32 to vector<8x256xf32>
    %11 = arith.maximumf %9, %10 : vector<8x256xf32>
    %c0_9 = arith.constant 0 : index
    %c0_10 = arith.constant 0 : index
    %c0_11 = arith.constant 0 : index
    %12 = vector.load %arg6[%c0_9, %c0_10, %c0_11] : memref<1x8x256xf32, #tpu.memory_space<vmem>>, vector<1x8x256xf32>
    %13 = vector.shape_cast %12 : vector<1x8x256xf32> to vector<8x256xf32>
    %14 = vector.shape_cast %11 : vector<8x256xf32> to vector<1x8x256xf32>
    tpu.vector_store %arg6[%c0_9, %c0_10, %c0_11], %14 {strides = array<i32>} : memref<1x8x256xf32, #tpu.memory_space<vmem>>, vector<1x8x256xf32>,
    return
  }
  func.func @transform_0(%arg0: i32, %arg1: i32) -> (i32, i32, i32) {
    %c0_i32 = arith.constant 0 : i32
    %c0_i32_0 = arith.constant 0 : i32
    return %arg0, %c0_i32, %arg1 : i32, i32, i32
  }
  func.func @transform_1(%arg0: i32, %arg1: i32) -> (i32, i32) {
    %c0_i32 = arith.constant 0 : i32
    %c0_i32_0 = arith.constant 0 : i32
    %c0_i32_1 = arith.constant 0 : i32
    return %c0_i32, %c0_i32_0 : i32, i32
  }
  func.func @transform_2(%arg0: i32, %arg1: i32) -> (i32, i32) {
    %c0_i32 = arith.constant 0 : i32
    %c0_i32_0 = arith.constant 0 : i32
    %c0_i32_1 = arith.constant 0 : i32
    return %c0_i32, %c0_i32_0 : i32, i32
  }
  func.func @transform_3(%arg0: i32, %arg1: i32) -> (i32, i32) {
    %c0_i32 = arith.constant 0 : i32
    %c0_i32_0 = arith.constant 0 : i32
    %c0_i32_1 = arith.constant 0 : i32
    return %c0_i32, %c0_i32_0 : i32, i32
  }
  func.func @transform_4(%arg0: i32, %arg1: i32) -> (i32, i32, i32) {
    %c0_i32 = arith.constant 0 : i32
    %c0_i32_0 = arith.constant 0 : i32
    return %arg0, %c0_i32, %arg1 : i32, i32, i32
  }
}

</mosaic_0001>

<bundles_post_ra>
// kernel: conv_bn_relu.1
= control target key start
LH: loop header
LB: loop body
LE: loop exit
PB: predicated region body
PF: predicated region fallthrough
CT: control target
= control target key end

     0   :  { %s521_s15 = smov 0   ;;  %s523_s16 = smov 0   ;;  %s567_s0 = inlined_call_operand.vmem [shape: bf16[2,27,256], index: 0, kind: input, shape index: {}]   ;;  %s568_s1 = inlined_call_operand.vmem [shape: bf16[8,27], index: 1, kind: input, shape index: {}]   ;;  %s569_s2 = inlined_call_operand.vmem [shape: f32[8,1], index: 2, kind: input, shape index: {}]   ;;  %s570_s3 = inlined_call_operand.vmem [shape: f32[8,1], index: 3, kind: input, shape index: {}]   ;;  %s571_s4 = inlined_call_operand.vmem [shape: f32[2,8,256], index: 4, kind: output, shape index: {}]  }
   0x1   :  { %s525_s17 = smov 0  }
   0x2 LB: > { %s26_s18 = sadd.s32 1, %s488_s16  ;;  %p412_p0 = scmp.ge.s32.totalorder %s492_s17, 1  ;;  %s492_s17 = sphi %s525_s17, %s14_s17   ;;  %s488_s16 = sphi %s523_s16, %s573_s16   ;;  %s484_s15 = sphi %s521_s15, %s572_s15  }
   0x3   : > { %p28_p1 = scmp.ge.s32.totalorder %s26_s18, 2  ;;  %p183_p2 = scmp.lt.s32.totalorder %s492_s17, 3 }
   0x5   : > { %s575_s18 = smov (%p28_p1, %s26_s18), 0  ;;  %p184_p3 = pnand %p412_p0, %p183_p2 }
   0x6   : > { %p218_p4 = scmp.lt.s32.totalorder (!%p184_p3), %s484_s15, 1 }
   0x7   : > { %187 = sbr.rel (%p184_p3) target bundleno = 162 (0xa2), region = 36 }
   0xc   : > { %vm265_vm0 = vcmask 1044480   ;;  %v301_v0 = vld [vmem:[%s569_s2] sm:$0xff]  ;;  %v494_v1 = vmov 0   ;;  %s577_s15 = smov (!%p218_p4, %s484_s15), 1  ;;  %vm266_vm1 = vcmask 1045504   ;;  %v495_v2 = vmov 65535  }
   0xd   : > { %469 = vset.pattern.permute.xlu0 %v494_v1  ;;  %v267_v3 = vsel %vm265_vm0, 4294967295, %v495_v2  ;;  %s437_s21 = sshll.u32 %s577_s15, 5  ;;  %v309_v10 = vld [vmem:[%s570_s3] sm:$0xff]  ;;  %vm261_vm2 = vcmask 220160   ;;  %s438_s29 = sshll.u32 %s577_s15, 4 }
   0xe   : > { %304 = vperm.xlu0 %469, %v301_v0   ;;  %s225_s24 = scalar_lea.vmem %s567_s0, %s437_s21  ;;  %v268_v4 = vsel %vm266_vm1, %v267_v3, 0  ;;  %v238_v20 = vld [vmem:[%s568_s1] sm:$0xf]  ;;  %s235_s6 = scalar_lea.vmem %s571_s4, %s438_s29 }
   0xf   : > { %v427_v5 = vld [vmem:[%s225_s24 + $0x10] sm:$0xf]  ;;  %v442_v6 = vld [vmem:[%s225_s24 + $0x14] sm:$0x30]  ;;  %v441_v7 = vld [vmem:[%s225_s24 + $0x14] sm:$0xf] }
  0x10   : > { %v428_v8 = vor.u32 %v442_v6, %v427_v5  ;;  %v429_v9 = vld [vmem:[%s225_s24 + $0x18] sm:$0x30]  ;;  %v419_v12 = vld [vmem:[%s225_s24] sm:$0xf]  ;;  %v440_v13 = vld [vmem:[%s225_s24 + $0x4] sm:$0xf0] }
  0x11   : > { %v432_v11 = vor.u32 %v441_v7, %v429_v9  ;;  %v439_v15 = vld [vmem:[%s225_s24 + $0x4] sm:$0xf]  ;;  %v421_v16 = vld [vmem:[%s225_s24 + $0x8] sm:$0xf0]  ;;  %v420_v18 = vor.u32 %v440_v13, %v419_v12 }
  0x12   : > { %v270_v14 = vand.u32 %v428_v8, %v268_v4  ;;  %v424_v19 = vor.u32 %v439_v15, %v421_v16 }
  0x13   : > { %v273_v17 = vand.u32 %v432_v11, %v268_v4 }
  0x14   : > { %281 = vmatpush.bf16.msra.mxu0 %v270_v14 }
  0x15   : > { %294 = vmatpush.bf16.msra.mxu1 %v273_v17 }
  0x16   : > { %312 = vperm.xlu0 %469, %v309_v10  }
  0x18   : > { %282 = vmatpush.bf16.msra.mxu0 %v420_v18 }
  0x19   : > { %295 = vmatpush.bf16.msra.mxu1 %v424_v19 }
  0x1b   : > { %433 = vmatmul.msk.bf16.vlgmr.msra.gmra.mxu0 %vm261_vm2, %v238_v20 }
  0x1c   : > { %434 = vmatmul.msk.bf16.vlgmr.msra.gmra.mxu1 %vm261_vm2, %v238_v20 }
  0x80   : > { %v305_v21 = vpop.permute.xlu0 %304 }
  0x88   : > { %v313_v25 = vpop.permute.xlu0 %312 }
  0x98   : > { %v284_v22 = vpop.f32.mrf.mxu0 }
  0x99   : > { %v307_v23 = vmul.f32 %v305_v21, %v284_v22  ;;  %v297_v24 = vpop.f32.mrf.mxu1 }
  0x9a   : > { %v308_v26 = vmul.f32 %v305_v21, %v297_v24 }
  0x9b   : > { %v315_v27 = vadd.f32 %v313_v25, %v307_v23 }
  0x9c   : > { %v316_v28 = vadd.f32 %v313_v25, %v308_v26 }
  0x9d   : > { %v317_v29 = vmax.f32 %v315_v27, 0.0 }
  0x9e   : > { %v318_v30 = vmax.f32 %v316_v28, 0.0 }
  0x9f   : > { %319 = vst [vmem:[%s235_s6] sm:$0xff] %v317_v29 }
  0xa0   : > { %320 = vst [vmem:[%s235_s6 + $0x8] sm:$0xff] %v318_v30  ;;  %v286_v31 = vpop.f32.mrf.mxu0 }
  0xa1   : > { %v299_v32 = vpop.f32.mrf.mxu1 }
  0xa2 PF: > { %s14_s17 = sadd.s32 1, %s492_s17   ;;  %s572_s15 = smov %s488_s16 }
  0xa3   : > { %p11_p5 = scmp.ge.s32.totalorder %s14_s17, 4   ;;  %s573_s16 = smov %s575_s18 }
  0xa5   :  { %13 = sbr.rel (!%p11_p5) target bundleno = 2 (0x2), region = 66 }

</bundles_post_ra>
